<compile_context>
chip_gen: v7x
topology: tpu7x:2x2x1
jax: 0.10.0
libtpu: 0.0.40
codegen_flags: <defaults>
</compile_context>

<pallas_src>
import jax
import jax.numpy as jnp
from jax.experimental import pallas as pl
from jax.experimental.pallas import tpu as pltpu


def cnn_block_kernel(x_ref, w_ref, b_ref, o_ref, xpad_ref):
    """Fused 'same' conv (K banded matmuls) + folded-BN bias + LeakyReLU(0.2).

    x_ref:    (B, H, W*Cin)        bf16 activations, (W, Cin) fused into lanes
    w_ref:    (K, W*Cin, W*Cout)   bf16 banded, BN-scale-folded weights
    b_ref:    (1, W*Cout)          f32 folded conv-bias + BN shift
    o_ref:    (B, H, W*Cout)       lane-dense output tile
    xpad_ref: (B, H+2P, W*Cin)     VMEM scratch: height-zero-padded copy of x
    """
    B, H, WCi = x_ref.shape
    K = w_ref.shape[0]
    WCo = o_ref.shape[2]
    Hp = xpad_ref.shape[1]
    P = (Hp - H) // 2

    # Height zero-pad inside VMEM (replaces a jnp.pad HBM pass in the wrapper).
    # Border rows are re-zeroed every step: scratch is per-core and persistent,
    # so a program_id==0 guard would be wrong under megacore grid sharding.
    if P > 0:
        zrows = jnp.zeros((B, P, WCi), dtype=xpad_ref.dtype)
        xpad_ref[:, pl.ds(0, P), :] = zrows
        xpad_ref[:, pl.ds(H + P, P), :] = zrows
    xpad_ref[:, pl.ds(P, H), :] = x_ref[...]

    # Accumulator initialised with the folded bias (saves a full-tile VPU add).
    acc = jnp.broadcast_to(b_ref[...], (B * H, WCo)).astype(jnp.float32)

    # K row taps, each a single fat matmul: M = B*H, Kdim = W*Cin, N = W*Cout.
    for kh in range(K):                               # static, unrolled taps
        xk = xpad_ref[:, pl.ds(kh, H), :].reshape(B * H, WCi)
        acc = acc + jnp.dot(xk, w_ref[kh], preferred_element_type=jnp.float32)

    y = jnp.maximum(acc, 0.2 * acc)                   # LeakyReLU(0.2)
    o_ref[...] = y.reshape(B, H, WCo).astype(o_ref.dtype)


def _pick_batch_block(n, h, target_m=256, min_m=128):
    """Largest divisor of n with B*h <= target_m; prefer >= 2 grid steps
    (megacore) only when that still keeps M = B*h >= min_m."""
    divisors = [d for d in range(1, n + 1) if n % d == 0]
    fitting = [d for d in divisors if d * h <= target_m]
    b = max(fitting) if fitting else 1
    if n // b < 2:
        smaller = [d for d in divisors if d < b and n // d >= 2 and d * h >= min_m]
        if smaller:
            b = max(smaller)
    return b


def cnn_block_forward_nhwc(x_nhwc, conv_w, conv_b, gamma, beta, run_mean,
                           run_var, *, kernel_size=3, padding=1, eps=1e-5,
                           block_batch=None):
    """NHWC-native fast path: no layout transposes, reshapes are layout-free."""
    N, H, W, Cin = x_nhwc.shape
    Cout = conv_w.shape[0]
    K = kernel_size
    assert 2 * padding == K - 1, "kernel assumes a 'same' convolution"

    B_blk = block_batch if block_batch is not None else _pick_batch_block(N, H)
    assert N % B_blk == 0

    # Activations: fuse (W, Cin) into the lane dim; bf16 MXU operands.
    x_rows = x_nhwc.reshape(N, H, W * Cin).astype(jnp.bfloat16)

    # Fold eval-mode BatchNorm into the conv weights / bias.
    scale = gamma / jnp.sqrt(run_var + eps)                        # (Cout,)
    bias = (conv_b - run_mean) * scale + beta                      # (Cout,)
    # PyTorch (O, Cin, kh, kw) -> (kh, kw, Cin, O), scale folded per out-chan.
    w_sc = jnp.transpose(conv_w, (2, 3, 1, 0)).astype(jnp.float32)
    w_sc = w_sc * scale.astype(jnp.float32)[None, None, None, :]

    # Banded (block-Toeplitz over output width) weights on the UNPADDED width:
    #   B[kh, p*Cin+c, w*Cout+o] = w_sc[kh, kw, c, o] with p = w + kw - pad;
    # out-of-range p (the width zero-pad) simply has no band entry.
    p_idx = jnp.arange(W)[None, :, None]
    w_idx = jnp.arange(W)[None, None, :]
    kw_idx = jnp.arange(K)[:, None, None]
    ind = (p_idx == w_idx + kw_idx - padding).astype(jnp.float32)   # (K, W, W)
    banded = jnp.einsum('kpw,hkco->hpcwo', ind, w_sc)   # (K, W, Cin, W, Cout)
    banded = banded.reshape(K, W * Cin, W * Cout).astype(jnp.bfloat16)
    # NOTE: banded is O(W^2 * Cin * Cout); for large widths, tile the output
    # width (extra grid axis; each block only needs its K*Cin-wide band) before
    # this outgrows VMEM (v7x scoped default 32 MiB).

    bias_row = jnp.tile(bias.astype(jnp.float32), W).reshape(1, W * Cout)

    out_dtype = x_nhwc.dtype
    cost = pl.CostEstimate(
        flops=2 * N * K * H * (W * Cin) * (W * Cout),
        transcendentals=0,
        bytes_accessed=(2 * x_rows.size + 2 * banded.size
                        + 4 * bias_row.size + 4 * N * H * W * Cout),
    )

    out = pl.pallas_call(
        cnn_block_kernel,
        out_shape=jax.ShapeDtypeStruct((N, H, W * Cout), out_dtype),
        grid_spec=pltpu.PrefetchScalarGridSpec(
            num_scalar_prefetch=0,
            grid=(N // B_blk,),
            in_specs=[
                pl.BlockSpec((B_blk, H, W * Cin), lambda n: (n, 0, 0)),   # imgs
                # Grid-invariant residents (constant index_map -> fetched once).
                pl.BlockSpec((K, W * Cin, W * Cout), lambda n: (0, 0, 0)),
                pl.BlockSpec((1, W * Cout), lambda n: (0, 0)),
            ],
            out_specs=pl.BlockSpec((B_blk, H, W * Cout), lambda n: (n, 0, 0)),
            scratch_shapes=[
                pltpu.VMEM((B_blk, H + 2 * padding, W * Cin), jnp.bfloat16),
            ],
        ),
        compiler_params=pltpu.CompilerParams(
            dimension_semantics=("parallel",)),
        cost_estimate=cost,
    )(x_rows, banded, bias_row)

    # TODO(synk): Dropout(p=0.3) is eval-mode identity here; training-mode
    # stochastic masking (and BN batch-stat updates) are omitted.

    return out.reshape(N, H, W, Cout)   # layout-free split of the lane dim


def cnn_block_forward(x_nchw, conv_w, conv_b, gamma, beta, run_mean, run_var,
                      *, kernel_size=3, padding=1, eps=1e-5, block_batch=None):
    """NCHW compatibility shim matching the PyTorch interface.  In an NHWC
    model, call cnn_block_forward_nhwc directly to skip both transposes."""
    x_nhwc = jnp.transpose(x_nchw, (0, 2, 3, 1))
    y = cnn_block_forward_nhwc(x_nhwc, conv_w, conv_b, gamma, beta, run_mean,
                               run_var, kernel_size=kernel_size,
                               padding=padding, eps=eps,
                               block_batch=block_batch)
    return jnp.transpose(y, (0, 3, 1, 2))


def reference_forward(x, conv_w, conv_b, gamma, beta, run_mean, run_var,
                      eps=1e-5):
    y = jax.lax.conv_general_dilated(
        x, conv_w, window_strides=(1, 1), padding=((1, 1), (1, 1)),
        dimension_numbers=("NCHW", "OIHW", "NCHW"))
    y = y + conv_b.reshape(1, -1, 1, 1)
    y = (y - run_mean.reshape(1, -1, 1, 1)) / jnp.sqrt(
        run_var.reshape(1, -1, 1, 1) + eps)
    y = y * gamma.reshape(1, -1, 1, 1) + beta.reshape(1, -1, 1, 1)
    return jnp.where(y > 0.0, y, 0.2 * y)


if __name__ == "__main__":
    # CNNBlock(in_chans=4, out_chans=8, kernel_size=3, padding=1) on (2,4,16,16).
    N, Cin, Cout, H, W, K = 2, 4, 8, 16, 16, 3

    key = jax.random.PRNGKey(0)
    k_x, k_w, k_b, k_g, k_be, k_m, k_v = jax.random.split(key, 7)

    x = jax.random.normal(k_x, (N, Cin, H, W), dtype=jnp.float32)
    conv_w = jax.random.normal(k_w, (Cout, Cin, K, K), dtype=jnp.float32) * 0.1
    conv_b = jax.random.normal(k_b, (Cout,), dtype=jnp.float32) * 0.1
    gamma = 1.0 + 0.1 * jax.random.normal(k_g, (Cout,), dtype=jnp.float32)
    beta = 0.1 * jax.random.normal(k_be, (Cout,), dtype=jnp.float32)
    run_mean = 0.1 * jax.random.normal(k_m, (Cout,), dtype=jnp.float32)
    run_var = 0.5 + jnp.abs(jax.random.normal(k_v, (Cout,), dtype=jnp.float32))

    y = cnn_block_forward(x, conv_w, conv_b, gamma, beta, run_mean, run_var,
                          kernel_size=K, padding=1)
    y = jax.block_until_ready(y)

    y_ref = reference_forward(x, conv_w, conv_b, gamma, beta, run_mean, run_var)
    assert y.shape == (N, Cout, H, W), y.shape
    # bf16 matmul operands (f32 accumulation) -> looser tolerance than pure f32.
    max_err = float(jnp.max(jnp.abs(y - y_ref)))
    assert jnp.allclose(y, y_ref, rtol=2e-2, atol=2e-2), max_err

    print("KERNEL_OK")
</pallas_src>

<mosaic_0001>
module attributes {stable_mosaic.version = 11 : i64} {
  func.func @cnn_block_kernel(%arg0: i32, %arg1: memref<2x16x64xbf16, #tpu.memory_space<vmem>>, %arg2: memref<3x64x128xbf16, #tpu.memory_space<vmem>>, %arg3: memref<1x128xf32, #tpu.memory_space<vmem>>, %arg4: memref<2x16x128xf32, #tpu.memory_space<vmem>>, %arg5: memref<2x18x64xbf16, #tpu.memory_space<vmem>>) attributes {dimension_semantics = [#tpu.dimension_semantics<parallel>], iteration_bounds = array<i64: 1>, scalar_prefetch = 0 : i64, scratch_operands = 1 : i64, tpu.core_type = #tpu.core_type<tc>, window_params = [{transform_indices = @transform_0, window_bounds = array<i64: 2, 16, 64>}, {pipeline_mode = #tpu.pipeline_mode<synchronous>, transform_indices = @transform_1, window_bounds = array<i64: 3, 64, 128>}, {pipeline_mode = #tpu.pipeline_mode<synchronous>, transform_indices = @transform_2, window_bounds = array<i64: 1, 128>}, {transform_indices = @transform_3, window_bounds = array<i64: 2, 16, 128>}]} {
    %cst = arith.constant 0.000000e+00 : bf16
    %0 = vector.broadcast %cst : bf16 to vector<2x1x64xbf16>
    %c0 = arith.constant 0 : index
    %c0_0 = arith.constant 0 : index
    %c0_1 = arith.constant 0 : index
    %1 = vector.load %arg5[%c0, %c0_0, %c0_1] : memref<2x18x64xbf16, #tpu.memory_space<vmem>>, vector<2x1x64xbf16>
    tpu.vector_store %arg5[%c0, %c0_0, %c0_1], %0 {strides = array<i32>} : memref<2x18x64xbf16, #tpu.memory_space<vmem>>, vector<2x1x64xbf16>,
    %c0_2 = arith.constant 0 : index
    %c17 = arith.constant 17 : index
    %c0_3 = arith.constant 0 : index
    %2 = vector.load %arg5[%c0_2, %c17, %c0_3] : memref<2x18x64xbf16, #tpu.memory_space<vmem>>, vector<2x1x64xbf16>
    tpu.vector_store %arg5[%c0_2, %c17, %c0_3], %0 {strides = array<i32>} : memref<2x18x64xbf16, #tpu.memory_space<vmem>>, vector<2x1x64xbf16>,
    %c0_4 = arith.constant 0 : index
    %c0_5 = arith.constant 0 : index
    %c0_6 = arith.constant 0 : index
    %3 = vector.load %arg1[%c0_4, %c0_5, %c0_6] : memref<2x16x64xbf16, #tpu.memory_space<vmem>>, vector<2x16x64xbf16>
    %c0_7 = arith.constant 0 : index
    %c1 = arith.constant 1 : index
    %c0_8 = arith.constant 0 : index
    %4 = vector.load %arg5[%c0_7, %c1, %c0_8] : memref<2x18x64xbf16, #tpu.memory_space<vmem>>, vector<2x16x64xbf16>
    tpu.vector_store %arg5[%c0_7, %c1, %c0_8], %3 {strides = array<i32>} : memref<2x18x64xbf16, #tpu.memory_space<vmem>>, vector<2x16x64xbf16>,
    %c0_9 = arith.constant 0 : index
    %c0_10 = arith.constant 0 : index
    %5 = vector.load %arg3[%c0_9, %c0_10] : memref<1x128xf32, #tpu.memory_space<vmem>>, vector<1x128xf32>
    %6 = vector.shape_cast %5 : vector<1x128xf32> to vector<1x128xf32>
    %7 = vector.broadcast %6 : vector<1x128xf32> to vector<32x128xf32>
    %c0_11 = arith.constant 0 : index
    %c0_12 = arith.constant 0 : index
    %c0_13 = arith.constant 0 : index
    %8 = vector.load %arg5[%c0_11, %c0_12, %c0_13] : memref<2x18x64xbf16, #tpu.memory_space<vmem>>, vector<2x16x64xbf16>
    %9 = vector.shape_cast %8 : vector<2x16x64xbf16> to vector<32x64xbf16>
    %c0_14 = arith.constant 0 : index
    %c0_15 = arith.constant 0 : index
    %c0_16 = arith.constant 0 : index
    %10 = vector.load %arg2[%c0_14, %c0_15, %c0_16] : memref<3x64x128xbf16, #tpu.memory_space<vmem>>, vector<1x64x128xbf16>
    %11 = vector.shape_cast %10 : vector<1x64x128xbf16> to vector<64x128xbf16>
    %cst_17 = arith.constant dense<0.000000e+00> : vector<32x128xf32>
    %12 = tpu.matmul %9, %11, %cst_17 {dimension_numbers = #tpu.dot_dimension_numbers<[1], [0], [0], [1], [0, 0, 1, 1], [], []>} : vector<32x64xbf16>, vector<64x128xbf16>, vector<32x128xf32> -> vector<32x128xf32>
    %13 = arith.addf %7, %12 : vector<32x128xf32>
    %c0_18 = arith.constant 0 : index
    %c1_19 = arith.constant 1 : index
    %c0_20 = arith.constant 0 : index
    %14 = vector.load %arg5[%c0_18, %c1_19, %c0_20] : memref<2x18x64xbf16, #tpu.memory_space<vmem>>, vector<2x16x64xbf16>
    %15 = vector.shape_cast %14 : vector<2x16x64xbf16> to vector<32x64xbf16>
    %c1_21 = arith.constant 1 : index
    %c0_22 = arith.constant 0 : index
    %c0_23 = arith.constant 0 : index
    %16 = vector.load %arg2[%c1_21, %c0_22, %c0_23] : memref<3x64x128xbf16, #tpu.memory_space<vmem>>, vector<1x64x128xbf16>
    %17 = vector.shape_cast %16 : vector<1x64x128xbf16> to vector<64x128xbf16>
    %cst_24 = arith.constant dense<0.000000e+00> : vector<32x128xf32>
    %18 = tpu.matmul %15, %17, %cst_24 {dimension_numbers = #tpu.dot_dimension_numbers<[1], [0], [0], [1], [0, 0, 1, 1], [], []>} : vector<32x64xbf16>, vector<64x128xbf16>, vector<32x128xf32> -> vector<32x128xf32>
    %19 = arith.addf %13, %18 : vector<32x128xf32>
    %c0_25 = arith.constant 0 : index
    %c2 = arith.constant 2 : index
    %c0_26 = arith.constant 0 : index
    %20 = vector.load %arg5[%c0_25, %c2, %c0_26] : memref<2x18x64xbf16, #tpu.memory_space<vmem>>, vector<2x16x64xbf16>
    %21 = vector.shape_cast %20 : vector<2x16x64xbf16> to vector<32x64xbf16>
    %c2_27 = arith.constant 2 : index
    %c0_28 = arith.constant 0 : index
    %c0_29 = arith.constant 0 : index
    %22 = vector.load %arg2[%c2_27, %c0_28, %c0_29] : memref<3x64x128xbf16, #tpu.memory_space<vmem>>, vector<1x64x128xbf16>
    %23 = vector.shape_cast %22 : vector<1x64x128xbf16> to vector<64x128xbf16>
    %cst_30 = arith.constant dense<0.000000e+00> : vector<32x128xf32>
    %24 = tpu.matmul %21, %23, %cst_30 {dimension_numbers = #tpu.dot_dimension_numbers<[1], [0], [0], [1], [0, 0, 1, 1], [], []>} : vector<32x64xbf16>, vector<64x128xbf16>, vector<32x128xf32> -> vector<32x128xf32>
    %25 = arith.addf %19, %24 : vector<32x128xf32>
    %cst_31 = arith.constant 2.000000e-01 : f32
    %26 = vector.broadcast %cst_31 : f32 to vector<32x128xf32>
    %27 = arith.mulf %26, %25 : vector<32x128xf32>
    %28 = arith.maximumf %25, %27 : vector<32x128xf32>
    %29 = vector.shape_cast %28 : vector<32x128xf32> to vector<2x16x128xf32>
    %c0_32 = arith.constant 0 : index
    %c0_33 = arith.constant 0 : index
    %c0_34 = arith.constant 0 : index
    %30 = vector.load %arg4[%c0_32, %c0_33, %c0_34] : memref<2x16x128xf32, #tpu.memory_space<vmem>>, vector<2x16x128xf32>
    tpu.vector_store %arg4[%c0_32, %c0_33, %c0_34], %29 {strides = array<i32>} : memref<2x16x128xf32, #tpu.memory_space<vmem>>, vector<2x16x128xf32>,
    return
  }
  func.func @transform_0(%arg0: i32) -> (i32, i32, i32) {
    %c0_i32 = arith.constant 0 : i32
    %c0_i32_0 = arith.constant 0 : i32
    %c0_i32_1 = arith.constant 0 : i32
    return %arg0, %c0_i32, %c0_i32_0 : i32, i32, i32
  }
  func.func @transform_1(%arg0: i32) -> (i32, i32, i32) {
    %c0_i32 = arith.constant 0 : i32
    %c0_i32_0 = arith.constant 0 : i32
    %c0_i32_1 = arith.constant 0 : i32
    %c0_i32_2 = arith.constant 0 : i32
    return %c0_i32, %c0_i32_0, %c0_i32_1 : i32, i32, i32
  }
  func.func @transform_2(%arg0: i32) -> (i32, i32) {
    %c0_i32 = arith.constant 0 : i32
    %c0_i32_0 = arith.constant 0 : i32
    %c0_i32_1 = arith.constant 0 : i32
    return %c0_i32, %c0_i32_0 : i32, i32
  }
  func.func @transform_3(%arg0: i32) -> (i32, i32, i32) {
    %c0_i32 = arith.constant 0 : i32
    %c0_i32_0 = arith.constant 0 : i32
    %c0_i32_1 = arith.constant 0 : i32
    return %arg0, %c0_i32, %c0_i32_0 : i32, i32, i32
  }
}

</mosaic_0001>

<bundles_post_ra>
// kernel: tpu_custom_call.1
= control target key start
LH: loop header
LB: loop body
LE: loop exit
PB: predicated region body
PF: predicated region fallthrough
CT: control target
= control target key end

     0   :  { %8 = vsyncpa [#allocation4], 0  ;;  %s884_s0 = inlined_call_operand.hbm [shape: bf16[2,16,64], index: 0, kind: input, shape index: {}]   ;;  %s885_s1 = inlined_call_operand.hbm [shape: bf16[3,64,128], index: 1, kind: input, shape index: {}]   ;;  %s886_s2 = inlined_call_operand.vmem [shape: f32[1,128], index: 2, kind: input, shape index: {}]   ;;  %s887_s3 = inlined_call_operand.hbm [shape: f32[2,16,128], index: 3, kind: output, shape index: {}]  }
   0x1   :  { %9 = vsyncpa [#allocation7], 0 }
   0x2   :  { %10 = vsyncpa [#allocation5], 0  ;;  %s731_s12 = smov [#allocation3]   ;;  %s659_s16 = scalar_lea.hbm %s884_s0, 256 }
   0x3   :  { %s16_s13 = sshll.u32 %s731_s12, 4  ;;  %p660_p0 = scmp.ne.s32.totalorder %s884_s0, %s659_s16  ;;  %s17_s13 = int_to_ptr.vmem [resolvable:$true] %s16_s13 }
   0x4   :  { %p663_p1 = scmp.lt.u32.totalorder %s659_s16, %s884_s0 }
   0x6   :  { %p665_p2 = pnand %p663_p1, %p660_p0 }
   0x8   :  { %668 = shalt.err (!%p665_p2)
}
   0x9   :  { %s669_s21 = scalar_lea.vmem %s17_s13, 256  ;;  %p674_p4 = scmp.lt.s32.totalorder %s17_s13, %s17_s13 }
   0xa   :  { %p670_p3 = scmp.ne.s32.totalorder %s17_s13, %s669_s21  ;;  %p675_p5 = scmp.lt.s32.totalorder %s669_s21, %s669_s21 }
   0xc   :  { %p676_p6 = por %p675_p5, %p674_p4 }
   0xe   :  { %p677_p7 = pnand %p676_p6, %p670_p3 }
  0x10   :  { %680 = shalt.err (!%p677_p7)
}
  0x11   :  { %s732_s22 = smov 64   ;;  %s733_s23 = smov 4  }
  0x12   :  { %22 = dma.hbm_to_vmem [thread:$0]  %s884_s0, 256, %s17_s13, [#allocation4], %s732_s22, %s732_s22, %s733_s23  }
  0x13   :  { %s734_s26 = smov [#allocation6]   ;;  %s681_s30 = scalar_lea.hbm %s885_s1, 1536 }
  0x14   :  { %s28_s27 = sshll.u32 %s734_s26, 4  ;;  %p682_p8 = scmp.ne.s32.totalorder %s885_s1, %s681_s30  ;;  %s29_s27 = int_to_ptr.vmem [resolvable:$true] %s28_s27 }
  0x15   :  { %p685_p9 = scmp.lt.u32.totalorder %s681_s30, %s885_s1 }
  0x17   :  { %p687_p10 = pnand %p685_p9, %p682_p8 }
  0x19   :  { %690 = shalt.err (!%p687_p10)
}
  0x1a   :  { %s691_s8 = scalar_lea.vmem %s29_s27, 1536  ;;  %p696_p12 = scmp.lt.s32.totalorder %s29_s27, %s29_s27 }
  0x1b   :  { %p692_p11 = scmp.ne.s32.totalorder %s29_s27, %s691_s8  ;;  %p697_p13 = scmp.lt.s32.totalorder %s691_s8, %s691_s8 }
  0x1d   :  { %p698_p0 = por %p697_p13, %p696_p12 }
  0x1f   :  { %p699_p1 = pnand %p698_p0, %p692_p11 }
  0x21   :  { %702 = shalt.err (!%p699_p1)
}
  0x22   :  { %34 = dma.hbm_to_vmem [thread:$0]  %s885_s1, 1536, %s29_s27, [#allocation7], %s732_s22, %s732_s22, %s733_s23  }
  0x23   :  { %725 = dma.done.wait [#allocation4], 256  }
  0x24   :  { %726 = vsyncadd [#allocation4], 4294967040 }
  0x25   :  { %727 = dma.done.wait [#allocation7], 1536  }
  0x26   :  { %728 = vsyncadd [#allocation7], 4294965760  ;;  %vm44_vm0 = vcmask 516096   ;;  %vm45_vm1 = vsmask.f32 256  ;;  %v645_v1 = vld [vmem:[#allocation6 + $0x20] sm:$0xff]  }
  0x27   :  { %vm783_vm2 = vmand %vm44_vm0, %vm45_vm1  ;;  %vm53_vm3 = vsmask.f32 7938  ;;  %v646_v2 = vld [vmem:[#allocation6 + $0x28] sm:$0xff]   ;;  %602 = vmatprep.subr.bf16.mxu0 %v645_v1  ;;  %vm65_vm5 = vsmask.f32 4368  ;;  %v648_v4 = vld [vmem:[#allocation6] sm:$0xff]  }
  0x28   :  { %vm788_vm4 = vmand %vm44_vm0, %vm53_vm3  ;;  %603 = vmatpush3.bf16.msra.mxu0 %v645_v1  ;;  %v647_v5 = vld [vmem:[#allocation6 + $0x30] sm:$0xff]   ;;  %590 = vmatprep.subr.bf16.mxu1 %v648_v4  ;;  %v650_v6 = vld [vmem:[#allocation6 + $0x8] sm:$0xff]   ;;  %vm107_vm6 = vcmask 519168   ;;  %vm177_vm9 = vcmask 523264   ;;  %vm243_vm10 = vsmask.f32 3328 }
  0x29   :  { %604 = vmatprep.subr.bf16.mxu0 %v646_v2  ;;  %591 = vmatpush3.bf16.msra.mxu1 %v648_v4  ;;  %v47_v7 = vld [vmem:[#allocation2] sm:$0x1]  ;;  %v50_v8 = vld [vmem:[#allocation2 + $0xc] sm:$0x1]  ;;  %v55_v9 = vld [vmem:[#allocation2 + $0x8] sm:$0x1] }
  0x2a   :  { %v649_v10 = vld [vmem:[#allocation6 + $0x38] sm:$0xff]   ;;  %592 = vmatprep.subr.bf16.mxu1 %v650_v6  ;;  %v48_v11 = vsel %vm783_vm2, 0, %v47_v7  ;;  %v51_v12 = vsel %vm783_vm2, 0, %v50_v8  ;;  %v56_v13 = vsel %vm788_vm4, 0, %v55_v9  ;;  %v58_v14 = vld [vmem:[#allocation2 + $0x14] sm:$0x1]  ;;  %vm804_vm7 = vmor %vm45_vm1, %vm65_vm5 }
  0x2b   :  { %49 = vst [vmem:[#allocation2] sm:$0x1] %v48_v11  ;;  %52 = vst [vmem:[#allocation2 + $0xc] sm:$0x1] %v51_v12  ;;  %v59_v15 = vsel %vm788_vm4, 0, %v58_v14  ;;  %v652_v18 = vld [vmem:[#allocation6 + $0x10] sm:$0xff]  }
  0x2c   :  { %605 = vmatpush3.bf16.msra.mxu0 %v646_v2  ;;  %57 = vst [vmem:[#allocation2 + $0x8] sm:$0x1] %v56_v13  ;;  %v61_v16 = vld [vmem:[#allocation3] sm:$0xf]  ;;  %v62_v17 = vld [vmem:[#allocation3 + $0x4] sm:$0xf]  ;;  %vm810_vm8 = vmand %vm107_vm6, %vm53_vm3 }
  0x2d   :  { %606 = vmatprep.subr.bf16.mxu0 %v647_v5  ;;  %60 = vst [vmem:[#allocation2 + $0x14] sm:$0x1] %v59_v15  ;;  %v63_v19 = vld [vmem:[#allocation3 + $0x8] sm:$0xf]  ;;  %v64_v20 = vld [vmem:[#allocation3 + $0xc] sm:$0xf]  ;;  %593 = vmatpush3.bf16.msra.mxu1 %v650_v6 }
  0x2e   :  { %v68_v21 = vshrl.u32 %v61_v16, 16  ;;  %v71_v22 = vshll.u32 %v61_v16, 16  ;;  %v76_v23 = vshrl.u32 %v62_v17, 16  ;;  %v79_v24 = vshll.u32 %v62_v17, 16  ;;  %v800_v30 = vld [vmem:[#allocation6 + $0x40] sm:$0xff]   ;;  %594 = vmatprep.subr.bf16.mxu1 %v652_v18  ;;  %v654_v46 = vld [vmem:[#allocation6 + $0x18] sm:$0xff]  }
  0x2f   :  { %v85_v25 = vshrl.u32 %v63_v19, 16  ;;  %v88_v26 = vshll.u32 %v63_v19, 16  ;;  %v93_v28 = vshrl.u32 %v64_v20, 16  ;;  %v96_v29 = vshll.u32 %v64_v20, 16  ;;  %s735_s11 = smov [#allocation8]  }
  0x30   :  { %607 = vmatpush3.bf16.msra.mxu0 %v647_v5  ;;  %v70_v27 = vrot.slane %v68_v21, 7  ;;  %v78_v32 = vrot.slane %v76_v23, 7  ;;  %vm244_vm11 = vsmask.f32 7440  ;;  %vm400_vm12 = vcmask 1042432   ;;  %s532_s12 = sshll.u32 %s735_s11, 4  ;;  %s533_s12 = int_to_ptr.vmem [resolvable:$true] %s532_s12 }
  0x31   :  { %608 = vmatprep.subr.bf16.mxu0 %v649_v10  ;;  %v87_v33 = vrot.slane %v85_v25, 7  ;;  %v95_v36 = vrot.slane %v93_v28, 7  ;;  %595 = vmatpush3.bf16.msra.mxu1 %v652_v18  ;;  %vm401_vm13 = vcmask 1046532   ;;  %vm835_vm14 = vmor %vm243_vm10, %vm244_vm11  ;;  %p708_p3 = scmp.lt.s32.totalorder %s533_s12, %s533_s12 }
  0x32   :  { %v73_v34 = vor.u32 %v71_v22, %v70_v27  ;;  %v74_v35 = vrot.slane %v70_v27, 4  ;;  %v81_v38 = vor.u32 %v79_v24, %v78_v32  ;;  %v83_v39 = vrot.slane %v78_v32, 4  ;;  %v109_v44 = vld [vmem:[#allocation2] sm:$0xf]  ;;  %v117_v50 = vld [vmem:[#allocation2 + $0xc] sm:$0xf]  ;;  %596 = vmatprep.subr.bf16.mxu1 %v654_v46  ;;  %vm842_vm15 = vmor %vm400_vm12, %vm401_vm13 }
  0x33   :  { %v90_v40 = vor.u32 %v88_v26, %v87_v33  ;;  %v91_v41 = vrot.slane %v87_v33, 4  ;;  %v98_v42 = vor.u32 %v96_v29, %v95_v36  ;;  %v100_v43 = vrot.slane %v95_v36, 4  ;;  %v114_v45 = vld [vmem:[#allocation2 + $0x8] sm:$0x1] }
  0x34   :  { %609 = vmatpush3.bf16.msra.mxu0 %v649_v10  ;;  %v82_v47 = vsel %vm804_vm7, %v74_v35, %v81_v38  ;;  %v110_v48 = vsel %vm810_vm8, %v73_v34, %v109_v44  ;;  %v115_v49 = vsel %vm783_vm2, %v83_v39, %v114_v45  ;;  %v121_v51 = vld [vmem:[#allocation2 + $0x14] sm:$0x1] }
  0x35   :  { %614 = vmatprep.subr.bf16.mxu0 %v800_v30  ;;  %v99_v52 = vsel %vm804_vm7, %v91_v41, %v98_v42  ;;  %111 = vst [vmem:[#allocation2] sm:$0xf] %v110_v48  ;;  %113 = vst.msk [vmem:[#allocation2 + $0x4] sm:$0xf] %vm107_vm6, %v82_v47  ;;  %v118_v53 = vsel %vm810_vm8, %v90_v40, %v117_v50  ;;  %v122_v54 = vsel %vm783_vm2, %v100_v43, %v121_v51  ;;  %v653_v44 = vld [vmem:[#allocation6 + $0x48] sm:$0xff]   ;;  %v658_v51 = vld [vmem:[#allocation6 + $0x58] sm:$0xff]  }
  0x36   :  { %116 = vst [vmem:[#allocation2 + $0x8] sm:$0x1] %v115_v49  ;;  %120 = vst.msk [vmem:[#allocation2 + $0x10] sm:$0xf] %vm107_vm6, %v99_v52  ;;  %597 = vmatpush3.bf16.msra.mxu1 %v654_v46  ;;  %v655_v46 = vld [vmem:[#allocation6 + $0x50] sm:$0xff]  }
  0x37   :  { %119 = vst [vmem:[#allocation2 + $0xc] sm:$0xf] %v118_v53  ;;  %123 = vst [vmem:[#allocation2 + $0x14] sm:$0x1] %v122_v54 }
  0x3c   :  { %v237_v55 = vld [vmem:[#allocation2] sm:$0xf]  ;;  %v238_v56 = vld [vmem:[#allocation2 + $0x4] sm:$0xf] }
  0x3d   :  { %v239_v57 = vld [vmem:[#allocation2 + $0x8] sm:$0x1]  ;;  %v247_v58 = vshrl.u32 %v237_v55, 16  ;;  %v250_v59 = vshll.u32 %v237_v55, 16  ;;  %v256_v60 = vshll.u32 %v238_v56, 16  ;;  %v260_v61 = vshrl.u32 %v238_v56, 16 }
  0x3e   :  { %v240_v62 = vld [vmem:[#allocation2 + $0xc] sm:$0xf]  ;;  %v266_v63 = vshll.u32 %v239_v57, 16  ;;  %v405_v0 = vrot.slane %v238_v56, 5  ;;  %v829_v1 = vld [vmem:[#allocation2 + $0x10] sm:$0xf] }
  0x3f   :  { %v271_v2 = vshrl.u32 %v240_v62, 16  ;;  %v249_v3 = vrot.slane %v247_v58, 4  ;;  %v252_v4 = vrot.slane %v250_v59, 5  ;;  %v258_v5 = vrot.slane %v256_v60, 5  ;;  %v242_v7 = vld [vmem:[#allocation2 + $0x14] sm:$0x1] }
  0x40   :  { %v262_v6 = vrot.slane %v260_v61, 4  ;;  %v268_v8 = vrot.slane %v266_v63, 5  ;;  %v274_v10 = vshll.u32 %v240_v62, 16  ;;  %v280_v11 = vshll.u32 %v829_v1, 16  ;;  %v656_v16 = vld [vmem:[#allocation2] sm:$0xff]   ;;  %v657_v17 = vld [vmem:[#allocation2 + $0xc] sm:$0xff]  }
  0x41   :  { %v273_v9 = vrot.slane %v271_v2, 4  ;;  %v253_v12 = vor.u32 %v252_v4, %v249_v3  ;;  %v284_v14 = vshrl.u32 %v829_v1, 16  ;;  %v290_v15 = vshll.u32 %v242_v7, 16  ;;  %598 = vmatprep.mubr.msk.bf16.mxu1 %vm177_vm9, %v656_v16  ;;  %v392_v29 = vld [vmem:[#allocation2] sm:$0xe] }
  0x42   :  { %v263_v13 = vor.u32 %v262_v6, %v258_v5  ;;  %v408_v19 = vrot.slane %v239_v57, 5  ;;  %v276_v20 = vrot.slane %v274_v10, 5  ;;  %v282_v21 = vrot.slane %v280_v11, 5  ;;  %599 = vmatmul.mubr.msk.bf16.vlgmr.msra.gmra.mrb[0].mxu1 %vm177_vm9, %v657_v17  ;;  %v393_v47 = vld [vmem:[#allocation2 + $0xc] sm:$0xe] }
  0x43   :  { %v407_v22 = vrot.slane %v405_v0, 4  ;;  %v254_v23 = vrot.slane %v253_v12, 4  ;;  %v286_v25 = vrot.slane %v284_v14, 4  ;;  %v292_v28 = vrot.slane %v290_v15, 5  ;;  %v545_v58 = vld [vmem:[%s886_s2] ss:$0 sm:$0xff] }
  0x44   :  { %v264_v24 = vrot.slane %v263_v13, 4  ;;  %v277_v27 = vor.u32 %v276_v20, %v273_v9  ;;  %v562_v34 = vrot.slane %v392_v29, 9  ;;  %v412_v45 = vrot.slane %v829_v1, 5  ;;  %s703_s2 = scalar_lea.vmem %s533_s12, 512 }
  0x45   :  { %v259_v31 = vsel %vm835_vm14, %v254_v23, %v258_v5  ;;  %v287_v33 = vor.u32 %v286_v25, %v282_v21  ;;  %v409_v37 = vsel %vm842_vm15, %v407_v22, %v408_v19  ;;  %v415_v48 = vrot.slane %v242_v7, 5  ;;  %p704_p2 = scmp.ne.s32.totalorder %s533_s12, %s703_s2  ;;  %p709_p4 = scmp.lt.s32.totalorder %s703_s2, %s703_s2 }
  0x46   :  { %v269_v32 = vsel %vm835_vm14, %v264_v24, %v268_v8  ;;  %v278_v36 = vrot.slane %v277_v27, 4  ;;  %v406_v39 = vsel %vm842_vm15, %v562_v34, %v405_v0  ;;  %v563_v49 = vrot.slane %v393_v47, 9 }
  0x47   :  { %v554_v35 = vcombine.low %v259_v31, %v269_v32  ;;  %v288_v38 = vrot.slane %v287_v33, 4  ;;  %v564_v42 = vcombine.low %v406_v39, %v409_v37  ;;  %v414_v50 = vrot.slane %v412_v45, 4  ;;  %p710_p5 = por %p709_p4, %p708_p3 }
  0x48   :  { %v283_v40 = vsel %vm835_vm14, %v278_v36, %v282_v21  ;;  %v413_v52 = vsel %vm842_vm15, %v563_v49, %v412_v45 }
  0x49   :  { %610 = vmatprep.mubr.msk.bf16.mxu0 %vm177_vm9, %v554_v35  ;;  %v293_v41 = vsel %vm835_vm14, %v288_v38, %v292_v28  ;;  %p711_p6 = pnand %p710_p5, %p704_p2 }
  0x4a   :  { %v555_v43 = vcombine.low %v283_v40, %v293_v41 }
  0x4c   :  { %611 = vmatmul.mubr.msk.bf16.vlgmr.msra.gmra.mrb[0].mxu0 %vm177_vm9, %v555_v43 }
  0x4d   :  { %615 = vmatpush3.bf16.msra.mxu0 %v800_v30  ;;  %622 = vmatprep.mubr.msk.bf16.mxu0 %vm177_vm9, %v564_v42  ;;  %v416_v30 = vsel %vm842_vm15, %v414_v50, %v415_v48 }
  0x4e   :  { %616 = vmatprep.subr.bf16.mxu0 %v653_v44  ;;  %v565_v53 = vcombine.low %v413_v52, %v416_v30 }
  0x51   :  { %617 = vmatpush3.bf16.msra.mxu0 %v653_v44 }
  0x52   :  { %618 = vmatprep.subr.bf16.mxu0 %v655_v46 }
  0x55   :  { %619 = vmatpush3.bf16.msra.mxu0 %v655_v46 }
  0x56   :  { %620 = vmatprep.subr.bf16.mxu0 %v658_v51 }
  0x59   :  { %621 = vmatpush3.bf16.msra.mxu0 %v658_v51 }
  0x5c   :  { %623 = vmatmul.mubr.msk.bf16.vlgmr.msra.gmra.mrb[0].mxu0 %vm177_vm9, %v565_v53 }
 0x115   :  { %v600_v54 = vpop.f32.mrb[0].mxu1 }
 0x116   :  { %v218_v55 = vpop.f32.mrb[1].mxu1  ;;  %v235_v59 = vadd.f32 %v600_v54, %v545_v58 }
 0x117   :  { %v601_v56 = vpop.f32.mrb[2].mxu1  ;;  %v233_v60 = vadd.f32 %v545_v58, %v218_v55 }
 0x118   :  { %v221_v57 = vpop.f32.mrb[3].mxu1  ;;  %v236_v62 = vadd.f32 %v601_v56, %v545_v58 }
 0x119   :  { %v234_v1 = vadd.f32 %v545_v58, %v221_v57 }
 0x12f   :  { %v624_v61 = vpop.f32.mrb[0].mxu0 }
 0x130   :  { %v627_v63 = vadd.f32 %v624_v61, %v235_v59  ;;  %v496_v0 = vpop.f32.mrb[1].mxu0 }
 0x131   :  { %v629_v2 = vadd.f32 %v496_v0, %v233_v60  ;;  %v625_v3 = vpop.f32.mrb[2].mxu0 }
 0x132   :  { %v517_v4 = vmul.f32 0.2, %v627_v63  ;;  %v631_v5 = vadd.f32 %v625_v3, %v236_v62  ;;  %v499_v6 = vpop.f32.mrb[3].mxu0 }
 0x133   :  { %v515_v7 = vmul.f32 0.2, %v629_v2  ;;  %v633_v8 = vadd.f32 %v499_v6, %v234_v1 }
 0x134   :  { %v521_v9 = vmax.f32 %v627_v63, %v517_v4  ;;  %v518_v10 = vmul.f32 0.2, %v631_v5 }
 0x135   :  { %v519_v11 = vmax.f32 %v629_v2, %v515_v7  ;;  %v516_v12 = vmul.f32 0.2, %v633_v8 }
 0x136   :  { %525 = vst [vmem:[#allocation8 + $0x10] sm:$0xff] %v521_v9  ;;  %v522_v13 = vmax.f32 %v631_v5, %v518_v10 }
 0x137   :  { %523 = vst [vmem:[#allocation8] sm:$0xff] %v519_v11  ;;  %v520_v14 = vmax.f32 %v633_v8, %v516_v12 }
 0x138   :  { %526 = vst [vmem:[#allocation8 + $0x18] sm:$0xff] %v522_v13 }
 0x139   :  { %524 = vst [vmem:[#allocation8 + $0x8] sm:$0xff] %v520_v14 }
 0x13a   :  { %714 = shalt.err (!%p711_p6)
}
 0x13b   :  { %s715_s15 = scalar_lea.hbm %s887_s3, 512 }
 0x13c   :  { %p716_p7 = scmp.ne.s32.totalorder %s887_s3, %s715_s15  ;;  %p719_p8 = scmp.lt.u32.totalorder %s715_s15, %s887_s3 }
 0x13e   :  { %p721_p9 = pnand %p719_p8, %p716_p7 }
 0x140   :  { %724 = shalt.err (!%p721_p9)
}
 0x141   :  { %s736_s20 = smov 128   ;;  %s737_s21 = smov 8  }
 0x142   :  { %538 = dma.vmem_to_hbm [thread:$0]  %s533_s12, 512, %s887_s3, [#allocation5], %s736_s20, %s736_s20, %s737_s21  }
 0x143   :  { %729 = dma.done.wait [#allocation5], 512  }
 0x144   :  { %730 = vsyncadd [#allocation5], 4294966784 }
 0x145   :  { %542 = vsyncpa [#allocation4], 1 }
 0x146   :  { %543 = vsyncpa [#allocation7], 1 }
 0x147   :  { %544 = vsyncpa [#allocation5], 1 }

</bundles_post_ra>
